<compile_context>
chip_gen: v5e
topology: v5e:2x2
jax: 0.10.0
libtpu: 0.0.40
codegen_flags: <defaults>
</compile_context>

<pallas_src>
import functools
import math

import jax
import jax.numpy as jnp
from jax.experimental import pallas as pl
from jax.experimental.pallas import tpu as pltpu


def fold_bn(gamma, beta, mean, var, eps=1e-5):
    scale = gamma / jnp.sqrt(var + eps)
    shift = beta - mean * scale
    return scale, shift


# ----------------------------- fused Pallas kernel ---------------------------

def _res_unit_kernel(xm_ref, xp_ref, xn_ref,
                     w1_ref, b1_ref, w2_ref, b2_ref,
                     w3_ref, b3_ref, wi_ref, bi_ref,
                     o_ref, *, W):
    """One (batch, row-tile) grid step of the fused ResUnit.

    Channels-first layout: activations are (channels, spatial), the flattened
    spatial positions of the tile sit on the 128-lane axis.
      xm_ref : (Cin, TW)  current input tile  (TW = TILE_ROWS * W, multiple of 128)
      xp_ref : (Cin, TW)  previous tile (source of the 1-row top halo)
      xn_ref : (Cin, TW)  next tile     (source of the 1-row bottom halo)
      w*_ref : BN-folded, transposed conv weights;  b*_ref : BN shifts (C, 1)
      o_ref  : (Cout, TW)
    """
    i = pl.program_id(1)
    last = pl.num_programs(1) - 1
    TW = xm_ref.shape[-1]
    f32 = jnp.float32

    w1 = w1_ref[...]
    b1 = b1_ref[...]

    def conv1(x):          # (Cin, n) -> (mid, n): 1x1 conv (+ folded BN) + ReLU
        return jnp.maximum(jnp.dot(w1, x, preferred_element_type=f32) + b1, 0.0)

    xm = xm_ref[...]
    y1m = conv1(xm)                                         # (mid, TW)

    # 1-row halos, recomputed from neighbouring input tiles; zeroed at the image
    # boundary (conv2's zero padding applies to the conv1 *output*, and
    # relu(b1) != 0 so we must mask, not rely on zero input).
    y1t = conv1(xp_ref[...][:, TW - W:])                    # row above the tile
    y1t = jnp.where(i > 0, y1t, 0.0)
    y1b = conv1(xn_ref[...][:, :W])                         # row below the tile
    y1b = jnp.where(i < last, y1b, 0.0)

    # conv1 output shifted by one image row up / down (still (mid, TW)).
    base_up = jnp.concatenate([y1t, y1m[:, :TW - W]], axis=1)   # value at p - W
    base_dn = jnp.concatenate([y1m[:, W:], y1b], axis=1)        # value at p + W

    # Horizontal boundary masks (left / right image column).
    wpos = jax.lax.broadcasted_iota(jnp.int32, (1, TW), 1) % W
    mask_l = (wpos != 0).astype(f32)
    mask_r = (wpos != W - 1).astype(f32)

    mid = y1m.shape[0]
    zcol = jnp.zeros((mid, 1), f32)
    parts = []
    for base in (base_up, y1m, base_dn):                    # ky = 0, 1, 2
        left = jnp.concatenate([zcol, base[:, :-1]], axis=1) * mask_l   # kx = 0
        right = jnp.concatenate([base[:, 1:], zcol], axis=1) * mask_r   # kx = 2
        parts += [left, base, right]
    stacked = jnp.concatenate(parts, axis=0)                # (9*mid, TW) im2col

    # conv2: one matmul with K = 9*mid, then BN shift + ReLU.
    y2 = jnp.maximum(
        jnp.dot(w2_ref[...], stacked, preferred_element_type=f32) + b2_ref[...],
        0.0)                                                # (mid, TW)

    # conv3 (1x1 + BN) + identity conv (1x1 + BN) + add + ReLU, fused.
    body = jnp.dot(w3_ref[...], y2, preferred_element_type=f32) + b3_ref[...]
    idn = jnp.dot(wi_ref[...], xm, preferred_element_type=f32) + bi_ref[...]
    o_ref[...] = jnp.maximum(body + idn, 0.0).astype(o_ref.dtype)


# ----------------------------- wrapper ---------------------------------------

def res_unit_forward(x_nchw, p):
    """ResUnit forward (bottleneck, stride=1, resize_identity=True). NCHW in/out."""
    B, Cin, H, W = x_nchw.shape
    mid = p["w1"].shape[1]
    Cout = p["w3"].shape[1]

    # ---- host-side prep: fold BN scale into weights, transpose for (C, N) math.
    s1, b1 = fold_bn(*p["bn1"])
    s2, b2 = fold_bn(*p["bn2"])
    s3, b3 = fold_bn(*p["bn3"])
    si, bi = fold_bn(*p["bnid"])
    w1t = (p["w1"] * s1[None, :]).T                                    # (mid, Cin)
    w2t = (p["w2"] * s2[None, None, None, :]).reshape(9 * mid, mid).T  # (mid, 9*mid)
    w3t = (p["w3"] * s3[None, :]).T                                    # (Cout, mid)
    wit = (p["wid"] * si[None, :]).T                                   # (Cout, Cin)
    b1c = b1.reshape(mid, 1)
    b2c = b2.reshape(mid, 1)
    b3c = b3.reshape(Cout, 1)
    bic = bi.reshape(Cout, 1)

    # ---- spatial row tiling: TILE_ROWS image rows per grid step so that the
    # flattened tile width TW = TILE_ROWS * W is a multiple of 128 lanes.
    r0 = 128 // math.gcd(W, 128)
    assert H % r0 == 0, "H must be a multiple of the minimal row tile"
    TR = r0
    TW = TR * W
    n_tiles = H // TR

    x_flat = x_nchw.reshape(B, Cin, H * W)   # free reshape; stays channels-first

    const = lambda b, i: (0, 0)              # weights: same block every grid step
    n_pos = B * H * W
    flops = 2 * n_pos * (Cin * mid + 9 * mid * mid + mid * Cout + Cin * Cout)
    bytes_accessed = 4 * (3 * B * Cin * H * W + B * Cout * H * W
                          + w1t.size + w2t.size + w3t.size + wit.size
                          + b1c.size + b2c.size + b3c.size + bic.size)

    out_flat = pl.pallas_call(
        functools.partial(_res_unit_kernel, W=W),
        out_shape=jax.ShapeDtypeStruct((B, Cout, H * W), jnp.float32),
        grid_spec=pltpu.PrefetchScalarGridSpec(
            num_scalar_prefetch=0,
            grid=(B, n_tiles),
            in_specs=[
                pl.BlockSpec((None, Cin, TW), lambda b, i: (b, 0, i)),
                pl.BlockSpec((None, Cin, TW),
                             lambda b, i: (b, 0, jnp.maximum(i - 1, 0))),
                pl.BlockSpec((None, Cin, TW),
                             lambda b, i: (b, 0, jnp.minimum(i + 1, n_tiles - 1))),
                pl.BlockSpec((mid, Cin), const),
                pl.BlockSpec((mid, 1), const),
                pl.BlockSpec((mid, 9 * mid), const),
                pl.BlockSpec((mid, 1), const),
                pl.BlockSpec((Cout, mid), const),
                pl.BlockSpec((Cout, 1), const),
                pl.BlockSpec((Cout, Cin), const),
                pl.BlockSpec((Cout, 1), const),
            ],
            out_specs=pl.BlockSpec((None, Cout, TW), lambda b, i: (b, 0, i)),
        ),
        compiler_params=pltpu.CompilerParams(
            dimension_semantics=("parallel", "parallel"),
            vmem_limit_bytes=32 * 1024 * 1024,   # fits v7x's 64 MiB physical VMEM
        ),
        cost_estimate=pl.CostEstimate(flops=flops, transcendentals=0,
                                      bytes_accessed=bytes_accessed),
    )(x_flat, x_flat, x_flat, w1t, b1c, w2t, b2c, w3t, b3c, wit, bic)

    return out_flat.reshape(B, Cout, H, W)        # free reshape back to NCHW


# ----------------------------- pure-JAX reference ----------------------------

def reference(x_nchw, p):
    hp = jax.lax.Precision.HIGHEST
    x = jnp.transpose(x_nchw, (0, 2, 3, 1))
    H, W = x.shape[1], x.shape[2]

    s1, b1 = fold_bn(*p["bn1"])
    y = jnp.maximum(jnp.einsum("bhwc,cd->bhwd", x, p["w1"], precision=hp) * s1 + b1, 0.0)

    s2, b2 = fold_bn(*p["bn2"])
    yp = jnp.pad(y, ((0, 0), (1, 1), (1, 1), (0, 0)))
    acc = 0.0
    for ky in range(3):
        for kx in range(3):
            acc = acc + jnp.einsum("bhwc,cd->bhwd",
                                   yp[:, ky:ky + H, kx:kx + W, :],
                                   p["w2"][ky, kx], precision=hp)
    y2 = jnp.maximum(acc * s2 + b2, 0.0)

    s3, b3 = fold_bn(*p["bn3"])
    si, bi = fold_bn(*p["bnid"])
    body = jnp.einsum("bhwc,cd->bhwd", y2, p["w3"], precision=hp) * s3 + b3
    idn = jnp.einsum("bhwc,cd->bhwd", x, p["wid"], precision=hp) * si + bi
    out = jnp.maximum(body + idn, 0.0)
    return jnp.transpose(out, (0, 3, 1, 2))


# ----------------------------- main -------------------------------------------

def make_bn_params(key, c):
    k1, k2, k3, k4 = jax.random.split(key, 4)
    gamma = 1.0 + 0.1 * jax.random.normal(k1, (c,), jnp.float32)
    beta = 0.1 * jax.random.normal(k2, (c,), jnp.float32)
    mean = 0.1 * jax.random.normal(k3, (c,), jnp.float32)
    var = jax.random.uniform(k4, (c,), jnp.float32, 0.5, 1.5)
    return (gamma, beta, mean, var)


if __name__ == "__main__":
    key = jax.random.PRNGKey(0)
    B, Cin, H, W = 2, 4, 16, 16
    Cout = 16
    mid = Cout // 4          # bottleneck_factor = 4
    # stride = 1; resize_identity = True because Cin != Cout.

    ks = jax.random.split(key, 10)
    x_nchw = jax.random.normal(ks[0], (B, Cin, H, W), jnp.float32)

    params = {
        "w1": 0.4 * jax.random.normal(ks[1], (Cin, mid), jnp.float32),
        "bn1": make_bn_params(ks[2], mid),
        "w2": 0.2 * jax.random.normal(ks[3], (3, 3, mid, mid), jnp.float32),
        "bn2": make_bn_params(ks[4], mid),
        "w3": 0.4 * jax.random.normal(ks[5], (mid, Cout), jnp.float32),
        "bn3": make_bn_params(ks[6], Cout),
        "wid": 0.4 * jax.random.normal(ks[7], (Cin, Cout), jnp.float32),
        "bnid": make_bn_params(ks[8], Cout),
    }

    out = res_unit_forward(x_nchw, params)
    out = jax.block_until_ready(out)

    ref = reference(x_nchw, params)
    assert out.shape == (B, Cout, H, W)
    assert jnp.allclose(out, ref, atol=1e-2, rtol=1e-2), "mismatch vs reference"

    print("KERNEL_OK")
</pallas_src>

<mosaic_0001>
module attributes {stable_mosaic.version = 11 : i64} {
  func.func @_res_unit_kernel(%arg0: i32, %arg1: i32, %arg2: memref<1x4x128xf32, #tpu.memory_space<vmem>>, %arg3: memref<1x4x128xf32, #tpu.memory_space<vmem>>, %arg4: memref<1x4x128xf32, #tpu.memory_space<vmem>>, %arg5: memref<4x4xf32, #tpu.memory_space<vmem>>, %arg6: memref<4x1xf32, #tpu.memory_space<vmem>>, %arg7: memref<4x36xf32, #tpu.memory_space<vmem>>, %arg8: memref<4x1xf32, #tpu.memory_space<vmem>>, %arg9: memref<16x4xf32, #tpu.memory_space<vmem>>, %arg10: memref<16x1xf32, #tpu.memory_space<vmem>>, %arg11: memref<16x4xf32, #tpu.memory_space<vmem>>, %arg12: memref<16x1xf32, #tpu.memory_space<vmem>>, %arg13: memref<1x16x128xf32, #tpu.memory_space<vmem>>) attributes {dimension_semantics = [#tpu.dimension_semantics<parallel>, #tpu.dimension_semantics<parallel>], iteration_bounds = array<i64: 2, 2>, scalar_prefetch = 0 : i64, scratch_operands = 0 : i64, tpu.core_type = #tpu.core_type<tc>, window_params = [{transform_indices = @transform_0, window_bounds = array<i64: 1, 4, 128>}, {transform_indices = @transform_1, window_bounds = array<i64: 1, 4, 128>}, {transform_indices = @transform_2, window_bounds = array<i64: 1, 4, 128>}, {pipeline_mode = #tpu.pipeline_mode<synchronous>, transform_indices = @transform_3, window_bounds = array<i64: 4, 4>}, {pipeline_mode = #tpu.pipeline_mode<synchronous>, transform_indices = @transform_4, window_bounds = array<i64: 4, 1>}, {pipeline_mode = #tpu.pipeline_mode<synchronous>, transform_indices = @transform_5, window_bounds = array<i64: 4, 36>}, {pipeline_mode = #tpu.pipeline_mode<synchronous>, transform_indices = @transform_6, window_bounds = array<i64: 4, 1>}, {pipeline_mode = #tpu.pipeline_mode<synchronous>, transform_indices = @transform_7, window_bounds = array<i64: 16, 4>}, {pipeline_mode = #tpu.pipeline_mode<synchronous>, transform_indices = @transform_8, window_bounds = array<i64: 16, 1>}, {pipeline_mode = #tpu.pipeline_mode<synchronous>, transform_indices = @transform_9, window_bounds = array<i64: 16, 4>}, {pipeline_mode = #tpu.pipeline_mode<synchronous>, transform_indices = @transform_10, window_bounds = array<i64: 16, 1>}, {transform_indices = @transform_11, window_bounds = array<i64: 1, 16, 128>}]} {
    %c0 = arith.constant 0 : index
    %c0_0 = arith.constant 0 : index
    %0 = vector.load %arg5[%c0, %c0_0] : memref<4x4xf32, #tpu.memory_space<vmem>>, vector<4x4xf32>
    %c0_1 = arith.constant 0 : index
    %c0_2 = arith.constant 0 : index
    %1 = vector.load %arg6[%c0_1, %c0_2] : memref<4x1xf32, #tpu.memory_space<vmem>>, vector<4x1xf32>
    %c0_3 = arith.constant 0 : index
    %c0_4 = arith.constant 0 : index
    %c0_5 = arith.constant 0 : index
    %2 = vector.load %arg2[%c0_3, %c0_4, %c0_5] : memref<1x4x128xf32, #tpu.memory_space<vmem>>, vector<1x4x128xf32>
    %3 = vector.shape_cast %2 : vector<1x4x128xf32> to vector<4x128xf32>
    %cst = arith.constant dense<0.000000e+00> : vector<4x128xf32>
    %4 = tpu.matmul %0, %3, %cst {dimension_numbers = #tpu.dot_dimension_numbers<[1], [0], [0], [1], [0, 0, 1, 1], [], []>} : vector<4x4xf32>, vector<4x128xf32>, vector<4x128xf32> -> vector<4x128xf32>
    %5 = vector.broadcast %1 : vector<4x1xf32> to vector<4x128xf32>
    %6 = arith.addf %4, %5 : vector<4x128xf32>
    %cst_6 = arith.constant 0.000000e+00 : f32
    %7 = vector.broadcast %cst_6 : f32 to vector<4x128xf32>
    %8 = arith.maximumf %6, %7 : vector<4x128xf32>
    %c0_7 = arith.constant 0 : index
    %c0_8 = arith.constant 0 : index
    %c0_9 = arith.constant 0 : index
    %9 = vector.load %arg3[%c0_7, %c0_8, %c0_9] : memref<1x4x128xf32, #tpu.memory_space<vmem>>, vector<1x4x128xf32>
    %10 = vector.shape_cast %9 : vector<1x4x128xf32> to vector<4x128xf32>
    %11 = vector.extract_strided_slice %10 {offsets = [0, 112], sizes = [4, 16], strides = [1, 1]} : vector<4x128xf32> to vector<4x16xf32>
    %cst_10 = arith.constant dense<0.000000e+00> : vector<4x16xf32>
    %12 = tpu.matmul %0, %11, %cst_10 {dimension_numbers = #tpu.dot_dimension_numbers<[1], [0], [0], [1], [0, 0, 1, 1], [], []>} : vector<4x4xf32>, vector<4x16xf32>, vector<4x16xf32> -> vector<4x16xf32>
    %13 = vector.broadcast %1 : vector<4x1xf32> to vector<4x16xf32>
    %14 = arith.addf %12, %13 : vector<4x16xf32>
    %cst_11 = arith.constant 0.000000e+00 : f32
    %15 = vector.broadcast %cst_11 : f32 to vector<4x16xf32>
    %16 = arith.maximumf %14, %15 : vector<4x16xf32>
    %c0_i32 = arith.constant 0 : i32
    %17 = arith.cmpi sgt, %arg1, %c0_i32 : i32
    %cst_12 = arith.constant 0.000000e+00 : f32
    %18 = vector.broadcast %cst_12 : f32 to vector<4x16xf32>
    %19 = arith.select %17, %16, %18 : vector<4x16xf32>
    %c0_13 = arith.constant 0 : index
    %c0_14 = arith.constant 0 : index
    %c0_15 = arith.constant 0 : index
    %20 = vector.load %arg4[%c0_13, %c0_14, %c0_15] : memref<1x4x128xf32, #tpu.memory_space<vmem>>, vector<1x4x128xf32>
    %21 = vector.shape_cast %20 : vector<1x4x128xf32> to vector<4x128xf32>
    %22 = vector.extract_strided_slice %21 {offsets = [0, 0], sizes = [4, 16], strides = [1, 1]} : vector<4x128xf32> to vector<4x16xf32>
    %cst_16 = arith.constant dense<0.000000e+00> : vector<4x16xf32>
    %23 = tpu.matmul %0, %22, %cst_16 {dimension_numbers = #tpu.dot_dimension_numbers<[1], [0], [0], [1], [0, 0, 1, 1], [], []>} : vector<4x4xf32>, vector<4x16xf32>, vector<4x16xf32> -> vector<4x16xf32>
    %24 = vector.broadcast %1 : vector<4x1xf32> to vector<4x16xf32>
    %25 = arith.addf %23, %24 : vector<4x16xf32>
    %cst_17 = arith.constant 0.000000e+00 : f32
    %26 = vector.broadcast %cst_17 : f32 to vector<4x16xf32>
    %27 = arith.maximumf %25, %26 : vector<4x16xf32>
    %c1_i32 = arith.constant 1 : i32
    %28 = arith.cmpi slt, %arg1, %c1_i32 : i32
    %cst_18 = arith.constant 0.000000e+00 : f32
    %29 = vector.broadcast %cst_18 : f32 to vector<4x16xf32>
    %30 = arith.select %28, %27, %29 : vector<4x16xf32>
    %31 = vector.extract_strided_slice %8 {offsets = [0, 0], sizes = [4, 112], strides = [1, 1]} : vector<4x128xf32> to vector<4x112xf32>
    %32 = tpu.concatenate %19, %31 in 1 : vector<4x16xf32>, vector<4x112xf32> -> vector<4x128xf32>
    %33 = vector.extract_strided_slice %8 {offsets = [0, 16], sizes = [4, 112], strides = [1, 1]} : vector<4x128xf32> to vector<4x112xf32>
    %34 = tpu.concatenate %33, %30 in 1 : vector<4x112xf32>, vector<4x16xf32> -> vector<4x128xf32>
    %35 = tpu.iota {dimensions = array<i32: 1>} : vector<1x128xi32>
    %c16_i32 = arith.constant 16 : i32
    %c0_i32_19 = arith.constant 0 : i32
    %36 = arith.cmpi eq, %c16_i32, %c0_i32_19 : i32
    %c1_i32_20 = arith.constant 1 : i32
    %37 = arith.select %36, %c1_i32_20, %c16_i32 : i32
    %38 = vector.broadcast %37 : i32 to vector<1x128xi32>
    %39 = arith.remsi %35, %38 : vector<1x128xi32>
    %c0_i32_21 = arith.constant 0 : i32
    %40 = vector.broadcast %c0_i32_21 : i32 to vector<1x128xi32>
    %41 = arith.cmpi ne, %39, %40 : vector<1x128xi32>
    %c0_i32_22 = arith.constant 0 : i32
    %42 = vector.broadcast %c0_i32_22 : i32 to vector<1x128xi32>
    %43 = arith.cmpi slt, %39, %42 : vector<1x128xi32>
    %c0_i32_23 = arith.constant 0 : i32
    %44 = arith.cmpi slt, %37, %c0_i32_23 : i32
    %45 = vector.broadcast %44 : i1 to vector<1x128xi1>
    %46 = vector.broadcast %45 : vector<1x128xi1> to vector<1x128xi1>
    %47 = arith.xori %43, %46 : vector<1x128xi1>
    %48 = arith.andi %47, %41 : vector<1x128xi1>
    %49 = vector.broadcast %37 : i32 to vector<1x128xi32>
    %50 = arith.addi %39, %49 : vector<1x128xi32>
    %51 = arith.select %48, %50, %39 : vector<1x128xi1>, vector<1x128xi32>
    %c0_i32_24 = arith.constant 0 : i32
    %52 = vector.broadcast %c0_i32_24 : i32 to vector<1x128xi32>
    %53 = arith.cmpi ne, %51, %52 : vector<1x128xi32>
    %54 = arith.extui %53 : vector<1x128xi1> to vector<1x128xi32>
    %55 = arith.sitofp %54 : vector<1x128xi32> to vector<1x128xf32>
    %c15_i32 = arith.constant 15 : i32
    %56 = vector.broadcast %c15_i32 : i32 to vector<1x128xi32>
    %57 = arith.cmpi ne, %51, %56 : vector<1x128xi32>
    %58 = arith.extui %57 : vector<1x128xi1> to vector<1x128xi32>
    %59 = arith.sitofp %58 : vector<1x128xi32> to vector<1x128xf32>
    %cst_25 = arith.constant 0.000000e+00 : f32
    %60 = vector.broadcast %cst_25 : f32 to vector<4x1xf32>
    %61 = vector.extract_strided_slice %32 {offsets = [0, 0], sizes = [4, 127], strides = [1, 1]} : vector<4x128xf32> to vector<4x127xf32>
    %62 = tpu.concatenate %60, %61 in 1 : vector<4x1xf32>, vector<4x127xf32> -> vector<4x128xf32>
    %63 = vector.broadcast %55 : vector<1x128xf32> to vector<4x128xf32>
    %64 = arith.mulf %62, %63 : vector<4x128xf32>
    %65 = vector.extract_strided_slice %32 {offsets = [0, 1], sizes = [4, 127], strides = [1, 1]} : vector<4x128xf32> to vector<4x127xf32>
    %66 = tpu.concatenate %65, %60 in 1 : vector<4x127xf32>, vector<4x1xf32> -> vector<4x128xf32>
    %67 = vector.broadcast %59 : vector<1x128xf32> to vector<4x128xf32>
    %68 = arith.mulf %66, %67 : vector<4x128xf32>
    %69 = vector.extract_strided_slice %8 {offsets = [0, 0], sizes = [4, 127], strides = [1, 1]} : vector<4x128xf32> to vector<4x127xf32>
    %70 = tpu.concatenate %60, %69 in 1 : vector<4x1xf32>, vector<4x127xf32> -> vector<4x128xf32>
    %71 = vector.broadcast %55 : vector<1x128xf32> to vector<4x128xf32>
    %72 = arith.mulf %70, %71 : vector<4x128xf32>
    %73 = vector.extract_strided_slice %8 {offsets = [0, 1], sizes = [4, 127], strides = [1, 1]} : vector<4x128xf32> to vector<4x127xf32>
    %74 = tpu.concatenate %73, %60 in 1 : vector<4x127xf32>, vector<4x1xf32> -> vector<4x128xf32>
    %75 = vector.broadcast %59 : vector<1x128xf32> to vector<4x128xf32>
    %76 = arith.mulf %74, %75 : vector<4x128xf32>
    %77 = vector.extract_strided_slice %34 {offsets = [0, 0], sizes = [4, 127], strides = [1, 1]} : vector<4x128xf32> to vector<4x127xf32>
    %78 = tpu.concatenate %60, %77 in 1 : vector<4x1xf32>, vector<4x127xf32> -> vector<4x128xf32>
    %79 = vector.broadcast %55 : vector<1x128xf32> to vector<4x128xf32>
    %80 = arith.mulf %78, %79 : vector<4x128xf32>
    %81 = vector.extract_strided_slice %34 {offsets = [0, 1], sizes = [4, 127], strides = [1, 1]} : vector<4x128xf32> to vector<4x127xf32>
    %82 = tpu.concatenate %81, %60 in 1 : vector<4x127xf32>, vector<4x1xf32> -> vector<4x128xf32>
    %83 = vector.broadcast %59 : vector<1x128xf32> to vector<4x128xf32>
    %84 = arith.mulf %82, %83 : vector<4x128xf32>
    %85 = tpu.concatenate %64, %32, %68, %72, %8, %76, %80, %34, %84 in 0 : vector<4x128xf32>, vector<4x128xf32>, vector<4x128xf32>, vector<4x128xf32>, vector<4x128xf32>, vector<4x128xf32>, vector<4x128xf32>, vector<4x128xf32>, vector<4x128xf32> -> vector<36x128xf32>
    %c0_26 = arith.constant 0 : index
    %c0_27 = arith.constant 0 : index
    %86 = vector.load %arg7[%c0_26, %c0_27] : memref<4x36xf32, #tpu.memory_space<vmem>>, vector<4x36xf32>
    %cst_28 = arith.constant dense<0.000000e+00> : vector<4x128xf32>
    %87 = tpu.matmul %86, %85, %cst_28 {dimension_numbers = #tpu.dot_dimension_numbers<[1], [0], [0], [1], [0, 0, 1, 1], [], []>} : vector<4x36xf32>, vector<36x128xf32>, vector<4x128xf32> -> vector<4x128xf32>
    %c0_29 = arith.constant 0 : index
    %c0_30 = arith.constant 0 : index
    %88 = vector.load %arg8[%c0_29, %c0_30] : memref<4x1xf32, #tpu.memory_space<vmem>>, vector<4x1xf32>
    %89 = vector.broadcast %88 : vector<4x1xf32> to vector<4x128xf32>
    %90 = arith.addf %87, %89 : vector<4x128xf32>
    %cst_31 = arith.constant 0.000000e+00 : f32
    %91 = vector.broadcast %cst_31 : f32 to vector<4x128xf32>
    %92 = arith.maximumf %90, %91 : vector<4x128xf32>
    %c0_32 = arith.constant 0 : index
    %c0_33 = arith.constant 0 : index
    %93 = vector.load %arg9[%c0_32, %c0_33] : memref<16x4xf32, #tpu.memory_space<vmem>>, vector<16x4xf32>
    %cst_34 = arith.constant dense<0.000000e+00> : vector<16x128xf32>
    %94 = tpu.matmul %93, %92, %cst_34 {dimension_numbers = #tpu.dot_dimension_numbers<[1], [0], [0], [1], [0, 0, 1, 1], [], []>} : vector<16x4xf32>, vector<4x128xf32>, vector<16x128xf32> -> vector<16x128xf32>
    %c0_35 = arith.constant 0 : index
    %c0_36 = arith.constant 0 : index
    %95 = vector.load %arg10[%c0_35, %c0_36] : memref<16x1xf32, #tpu.memory_space<vmem>>, vector<16x1xf32>
    %96 = vector.broadcast %95 : vector<16x1xf32> to vector<16x128xf32>
    %97 = arith.addf %94, %96 : vector<16x128xf32>
    %c0_37 = arith.constant 0 : index
    %c0_38 = arith.constant 0 : index
    %98 = vector.load %arg11[%c0_37, %c0_38] : memref<16x4xf32, #tpu.memory_space<vmem>>, vector<16x4xf32>
    %cst_39 = arith.constant dense<0.000000e+00> : vector<16x128xf32>
    %99 = tpu.matmul %98, %3, %cst_39 {dimension_numbers = #tpu.dot_dimension_numbers<[1], [0], [0], [1], [0, 0, 1, 1], [], []>} : vector<16x4xf32>, vector<4x128xf32>, vector<16x128xf32> -> vector<16x128xf32>
    %c0_40 = arith.constant 0 : index
    %c0_41 = arith.constant 0 : index
    %100 = vector.load %arg12[%c0_40, %c0_41] : memref<16x1xf32, #tpu.memory_space<vmem>>, vector<16x1xf32>
    %101 = vector.broadcast %100 : vector<16x1xf32> to vector<16x128xf32>
    %102 = arith.addf %99, %101 : vector<16x128xf32>
    %103 = arith.addf %97, %102 : vector<16x128xf32>
    %cst_42 = arith.constant 0.000000e+00 : f32
    %104 = vector.broadcast %cst_42 : f32 to vector<16x128xf32>
    %105 = arith.maximumf %103, %104 : vector<16x128xf32>
    %c0_43 = arith.constant 0 : index
    %c0_44 = arith.constant 0 : index
    %c0_45 = arith.constant 0 : index
    %106 = vector.load %arg13[%c0_43, %c0_44, %c0_45] : memref<1x16x128xf32, #tpu.memory_space<vmem>>, vector<1x16x128xf32>
    %107 = vector.shape_cast %106 : vector<1x16x128xf32> to vector<16x128xf32>
    %108 = vector.shape_cast %105 : vector<16x128xf32> to vector<1x16x128xf32>
    tpu.vector_store %arg13[%c0_43, %c0_44, %c0_45], %108 {strides = array<i32>} : memref<1x16x128xf32, #tpu.memory_space<vmem>>, vector<1x16x128xf32>,
    return
  }
  func.func @transform_0(%arg0: i32, %arg1: i32) -> (i32, i32, i32) {
    %c0_i32 = arith.constant 0 : i32
    %c0_i32_0 = arith.constant 0 : i32
    return %arg0, %c0_i32, %arg1 : i32, i32, i32
  }
  func.func @transform_1(%arg0: i32, %arg1: i32) -> (i32, i32, i32) {
    %c1_i32 = arith.constant 1 : i32
    %0 = arith.subi %arg1, %c1_i32 : i32
    %c0_i32 = arith.constant 0 : i32
    %1 = arith.maxsi %0, %c0_i32 : i32
    %c0_i32_0 = arith.constant 0 : i32
    %c0_i32_1 = arith.constant 0 : i32
    return %arg0, %c0_i32_0, %1 : i32, i32, i32
  }
  func.func @transform_2(%arg0: i32, %arg1: i32) -> (i32, i32, i32) {
    %c1_i32 = arith.constant 1 : i32
    %0 = arith.addi %arg1, %c1_i32 : i32
    %c1_i32_0 = arith.constant 1 : i32
    %1 = arith.minsi %0, %c1_i32_0 : i32
    %c0_i32 = arith.constant 0 : i32
    %c0_i32_1 = arith.constant 0 : i32
    return %arg0, %c0_i32, %1 : i32, i32, i32
  }
  func.func @transform_3(%arg0: i32, %arg1: i32) -> (i32, i32) {
    %c0_i32 = arith.constant 0 : i32
    %c0_i32_0 = arith.constant 0 : i32
    %c0_i32_1 = arith.constant 0 : i32
    return %c0_i32, %c0_i32_0 : i32, i32
  }
  func.func @transform_4(%arg0: i32, %arg1: i32) -> (i32, i32) {
    %c0_i32 = arith.constant 0 : i32
    %c0_i32_0 = arith.constant 0 : i32
    %c0_i32_1 = arith.constant 0 : i32
    return %c0_i32, %c0_i32_0 : i32, i32
  }
  func.func @transform_5(%arg0: i32, %arg1: i32) -> (i32, i32) {
    %c0_i32 = arith.constant 0 : i32
    %c0_i32_0 = arith.constant 0 : i32
    %c0_i32_1 = arith.constant 0 : i32
    return %c0_i32, %c0_i32_0 : i32, i32
  }
  func.func @transform_6(%arg0: i32, %arg1: i32) -> (i32, i32) {
    %c0_i32 = arith.constant 0 : i32
    %c0_i32_0 = arith.constant 0 : i32
    %c0_i32_1 = arith.constant 0 : i32
    return %c0_i32, %c0_i32_0 : i32, i32
  }
  func.func @transform_7(%arg0: i32, %arg1: i32) -> (i32, i32) {
    %c0_i32 = arith.constant 0 : i32
    %c0_i32_0 = arith.constant 0 : i32
    %c0_i32_1 = arith.constant 0 : i32
    return %c0_i32, %c0_i32_0 : i32, i32
  }
  func.func @transform_8(%arg0: i32, %arg1: i32) -> (i32, i32) {
    %c0_i32 = arith.constant 0 : i32
    %c0_i32_0 = arith.constant 0 : i32
    %c0_i32_1 = arith.constant 0 : i32
    return %c0_i32, %c0_i32_0 : i32, i32
  }
  func.func @transform_9(%arg0: i32, %arg1: i32) -> (i32, i32) {
    %c0_i32 = arith.constant 0 : i32
    %c0_i32_0 = arith.constant 0 : i32
    %c0_i32_1 = arith.constant 0 : i32
    return %c0_i32, %c0_i32_0 : i32, i32
  }
  func.func @transform_10(%arg0: i32, %arg1: i32) -> (i32, i32) {
    %c0_i32 = arith.constant 0 : i32
    %c0_i32_0 = arith.constant 0 : i32
    %c0_i32_1 = arith.constant 0 : i32
    return %c0_i32, %c0_i32_0 : i32, i32
  }
  func.func @transform_11(%arg0: i32, %arg1: i32) -> (i32, i32, i32) {
    %c0_i32 = arith.constant 0 : i32
    %c0_i32_0 = arith.constant 0 : i32
    return %arg0, %c0_i32, %arg1 : i32, i32, i32
  }
}

</mosaic_0001>

<bundles_post_ra>
// kernel: tpu_custom_call.1
= control target key start
LH: loop header
LB: loop body
LE: loop exit
PB: predicated region body
PF: predicated region fallthrough
CT: control target
= control target key end

     0   :  { %s1458_s0 = inlined_call_operand.vmem [shape: f32[2,4,256], index: 0, kind: input, shape index: {}]   ;;  %s1459_s1 = inlined_call_operand.vmem [shape: f32[2,4,256], index: 1, kind: input, shape index: {}]   ;;  %s1460_s2 = inlined_call_operand.vmem [shape: f32[2,4,256], index: 2, kind: input, shape index: {}]   ;;  %s1461_s3 = inlined_call_operand.vmem [shape: f32[4,4], index: 3, kind: input, shape index: {}]   ;;  %s1462_s4 = inlined_call_operand.vmem [shape: f32[4,1], index: 4, kind: input, shape index: {}]   ;;  %s1463_s5 = inlined_call_operand.vmem [shape: f32[4,36], index: 5, kind: input, shape index: {}]   ;;  %s1464_s6 = inlined_call_operand.vmem [shape: f32[4,1], index: 6, kind: input, shape index: {}]   ;;  %s1465_s7 = inlined_call_operand.vmem [shape: f32[16,4], index: 7, kind: input, shape index: {}]   ;;  %s1466_s8 = inlined_call_operand.vmem [shape: f32[16,1], index: 8, kind: input, shape index: {}]   ;;  %s1467_s9 = inlined_call_operand.vmem [shape: f32[16,4], index: 9, kind: input, shape index: {}]   ;;  %s1468_s10 = inlined_call_operand.vmem [shape: f32[16,1], index: 10, kind: input, shape index: {}]   ;;  %s1469_s11 = inlined_call_operand.hbm [shape: f32[2,16,256], index: 11, kind: output, shape index: {}]  }
   0x1   :  { %1475 = sst [smem:[#allocation11_spill]] %s1458_s0 }
   0x2   :  { %1476 = sst [smem:[#allocation12_spill]] %s1461_s3 }
   0x3   :  { %16 = vsyncpa [#allocation3], 0 }
   0x4   :  { %18 = vsyncpa [#allocation3 + $0x1], 0  ;;  %s1254_s17 = smov 0   ;;  %s1256_s18 = smov 0  }
   0x5   :  { %s1258_s19 = smov 0   ;;  %s1260_s20 = smov 0  }
   0x6   :  { %s1262_s21 = smov 0   ;;  %s1264_s22 = smov 0  }
   0x7   :  { %s1266_s23 = smov 0   ;;  %s1268_s24 = smov 0  }
   0x8 LB: > { %1477 = sst [smem:[#allocation5_spill]] %s1163_s19  ;;  %s960_s25 = sadd.s32 4294967295, %s1183_s24   ;;  %s1183_s24 = sphi %s1268_s24, %s24_s24   ;;  %s1179_s23 = sphi %s1266_s23, %s1495_s23   ;;  %s1175_s22 = sphi %s1264_s22, %s1491_s22   ;;  %s1171_s21 = sphi %s1262_s21, %s1490_s21   ;;  %s1167_s20 = sphi %s1260_s20, %s1489_s20   ;;  %s1163_s19 = sphi %s1258_s19, %s1488_s19   ;;  %s1159_s18 = sphi %s1256_s18, %s1494_s18   ;;  %s1155_s17 = sphi %s1254_s17, %s1493_s17  }
   0x9   : > { %1478 = sst [smem:[#allocation6_spill]] %s1175_s22  ;;  %s961_s26 = sadd.s32 4294967294, %s1183_s24  }
   0xa   : > { %1479 = sst [smem:[#allocation7_spill]] %s1179_s23  ;;  %s33_s27 = sadd.s32 1, %s1175_s22 }
   0xb   : > { %p34_p0 = scmp.ge.s32.totalorder %s33_s27, 2  ;;  %s36_s28 = sadd.s32 1, %s1179_s23 }
   0xc   : > { %p319_p1 = scmp.ne.s32.totalorder %s1163_s19, %s1159_s18  ;;  %p320_p2 = scmp.eq.s32.totalorder %s960_s25, 3 }
   0xd   : > { %s1497_s27 = smov (%p34_p0, %s33_s27), 0  ;;  %s1499_s28 = smov (!%p34_p0, %s36_s28), %s1179_s23 }
   0xe   : > { %1480 = sst [smem:[#allocation8_spill]] %s1497_s27  ;;  %s305_s29 = ssub.s32 %s1175_s22, %s1497_s27 }
   0xf   : > { %p1305_p3 = por %p320_p2, %p319_p1  ;;  %p38_p4 = scmp.ge.s32.totalorder %s1499_s28, 2 }
  0x10   : > { %p325_p5 = scmp.ne.s32.totalorder %s1159_s18, %s1155_s17  ;;  %p326_p6 = scmp.eq.s32.totalorder %s961_s26, 3 }
  0x11   : > { %p966_p7 = scmp.ge.s32.totalorder %s1183_s24, 1  ;;  %s1501_s28 = smov (%p38_p4, %s1499_s28), 0 }
  0x12   : > { %1482 = sst [smem:[#allocation9_spill]] %s1501_s28  ;;  %p1314_p8 = por %p326_p6, %p325_p5 }
  0x13   : > { %p413_p9 = scmp.lt.s32.totalorder %s1183_s24, 5  ;;  %s304_s13 = ssub.s32 %s1179_s23, %s1501_s28 }
  0x14   : > { %s309_s14 = sadd.s32 1, %s1163_s19  ;;  %s306_s15 = sor.u32 %s305_s29, %s304_s13 }
  0x15   : > { %p414_p10 = pnand %p966_p7, %p413_p9  ;;  %p307_p11 = scmp.eq.s32.totalorder %s306_s15, 0 }
  0x16   : > { %p478_p12 = scmp.lt.s32.totalorder (!%p414_p10), %s1171_s21, 1  ;;  %p480_p13 = scmp.lt.s32.totalorder (!%p414_p10), %s1167_s20, 1 }
  0x17   : > { %s1323_s16 = scalar_select %p307_p11, %s1163_s19, %s309_s14  }
  0x18   : > { %417 = sbr.rel (%p414_p10) target bundleno = 692 (0x2b4), region = 64  ;;  %s970_s25 = sadd.s32 (!%p414_p10), 4294967295, %s1167_s20 }
  0x19   : > { %1484 = sst [smem:[#allocation10_spill]] %s1323_s16  ;;  %p487_p0 = scmp.gt.s32.totalorder (!%p414_p10), %s970_s25, 0 }
  0x1a   : > { %p971_p1 = scmp.lt.s32.totalorder (!%p414_p10), %s970_s25, 1  ;;  %s500_s28 = sadd.s32 (!%p414_p10), 1, %s1167_s20 }
  0x1b   : > { %s1485_s0 = sld [smem:[#allocation11_spill]] (!%p414_p10)  ;;  %p501_p2 = scmp.lt.s32.totalorder (!%p414_p10), %s500_s28, 1 }
  0x1c   : > { %s1486_s3 = sld [smem:[#allocation12_spill]] (!%p414_p10)  ;;  %p578_p4 = scmp.gt.s32.totalorder (!%p414_p10), %s1167_s20, 0 }
  0x1d   : > { %s479_s26 = scalar_select %p478_p12, %s1171_s21, 1  ;;  %v1185_v0 = vmov 0   ;;  %vm526_vm0 = vcmask 1043456   ;;  %vm522_vm1 = vcmask 31744   ;;  %v515_v5 = vld [vmem:[%s1462_s4] sm:$0xf]  ;;  %v628_v29 = vlaneseq }
  0x1e   : > { %1086 = vset.pattern.permute.xlu0 %v1185_v0  ;;  %1087 = vset.pattern.permute.xlu1 %v1185_v0  ;;  %s481_s29 = scalar_select %p480_p13, %s1167_s20, 1  ;;  %v777_v7 = vld [vmem:[%s1467_s9] sm:$0xff]  ;;  %vm617_vm4 = vcmask 130048   ;;  %vm626_vm5 = vcmask 916480   ;;  %vm658_vm7 = vcmask 1039360   ;;  %v1190_v34 = vmov 0.0  }
  0x1f   : > { %1088 = vset.pattern.permute.xlu2 %v1185_v0  ;;  %s968_s13 = sshll.u32 %s479_s26, 1  ;;  %s1503_s25 = smov (!%p487_p0, %s970_s25), 0  ;;  %v697_v15 = vld [vmem:[%s1464_s6] sm:$0xf]  ;;  %v629_v30 = vand.u32 127, %v628_v29  ;;  %vm652_vm9 = vcmask 7168  }
  0x20   : > { %s483_s14 = sadd.s32 %s968_s13, %s481_s29  ;;  %s1505_s28 = smov (!%p501_p2, %s500_s28), 1  ;;  %v779_v18 = vld [vmem:[%s1468_s10] sm:$0xff]  ;;  %vm703_vm10 = vcmask 293888   ;;  %v778_v62 = vld [vmem:[%s1467_s9 + $0x8] sm:$0xff] }
  0x21   : > { %s969_s15 = sshll.u32 %s483_s14, 2  ;;  %s1507_s25 = smov (!%p971_p1, %s1503_s25), 1  ;;  %v634_v31 = vand.u32 15, %v629_v30  ;;  %v696_v61 = vld [vmem:[%s1463_s5] sm:$0xf]  ;;  %v780_v0 = vld [vmem:[%s1468_s10 + $0x8] sm:$0xff] }
  0x22   : > { %s485_s22 = scalar_lea.vmem %s1485_s0, %s969_s15  ;;  %v514_v1 = vld [vmem:[%s1486_s3] sm:$0xf]  ;;  %s1509_s28 = smov (!%p501_p2, %s1505_s28), 1 }
  0x23   : > { %v516_v2 = vld [vmem:[%s485_s22] sm:$0xf]  ;;  %s494_s26 = sadd.s32 %s1507_s25, %s968_s13  ;;  %s508_s14 = sadd.s32 %s968_s13, %s1509_s28  ;;  %vm645_vm6 = vcmp.ne.s32.totalorder %v634_v31, 15  ;;  %vm642_vm8 = vcmp.ne.s32.totalorder %v634_v31, 0 }
  0x24   : > { %983 = vmatpush.msk.msra.mxu2 %vm526_vm0, %v516_v2  ;;  %s977_s29 = sshll.u32 %s494_s26, 2  ;;  %s982_s19 = sshll.u32 %s508_s14, 2  ;;  %v990_v35 = vsel %vm645_vm6, 1.0, %v1190_v34  ;;  %v989_v41 = vsel %vm642_vm8, 1.0, %v1190_v34  ;;  %v733_v63 = vld [vmem:[%s1466_s8] sm:$0xff] }
  0x25   : > { %984 = vmatmul.msk.f32.vlgmr.msra.gmra.mxu2 %vm522_vm1, %v514_v1  ;;  %s496_s15 = scalar_lea.vmem %s1459_s1, %s977_s29  ;;  %s510_s22 = scalar_lea.vmem %s1460_s2, %s982_s19 }
  0x26   : > { %v551_v3 = vld [vmem:[%s496_s15] sm:$0xf]  ;;  %s1186_s3 = smov 16   ;;  %s1187_s29 = smov 1  }
  0x27   : > { %553 = vrot.lane.b32.xlu0 %v551_v3, %s1186_s3  ;;  %v583_v4 = vld [vmem:[%s510_s22] sm:$0xf]  ;;  %s609_s26 = scalar_select %p480_p13, 1, 0 }
  0x28   : > { %987 = vmatpush.msk.msrb.mxu2 %vm526_vm0, %v583_v4  ;;  %s1188_s14 = smov 112   ;;  %s475_s22 = sand.u32 1, %s1159_s18  }
  0x29   : > { %v610_v12 = vstv %s609_s26  ;;  %s579_s16 = scalar_select %p578_p4, 1, 0 }
  0x2a   : > { %vm611_vm2 = vcmp.eq.s32.totalorder %v610_v12, 1  ;;  %s1000_s25 = sshll.u32 %s1171_s21, 2  ;;  %s967_s28 = sshll.u32 %s475_s22, 4 }
  0x2b   : > { %v580_v19 = vstv %s579_s16  ;;  %s837_s0 = sadd.s32 %s1167_s20, %s1000_s25  ;;  %s477_s26 = scalar_lea.vmem [#allocation2], %s967_s28 }
  0x2c   : > { %vm581_vm3 = vcmp.eq.s32.totalorder %v580_v19, 1  ;;  %s1001_s13 = sshll.u32 %s837_s0, 3  ;;  %s840_s27 = sshll.u32 %s477_s26, 4  ;;  %s841_s27 = int_to_ptr.vmem [resolvable:$true] %s840_s27 }
  0x2d   : > { %988 = vmatmul.msk.f32.vlgmr.msrb.gmra.mxu2 %vm522_vm1, %v514_v1  ;;  %s839_s23 = scalar_lea.hbm %s1469_s11, %s1001_s13  ;;  %s827_s20 = scalar_lea.sflag [#allocation3], %s475_s22 }
  0x2e   : > { %s842_s21 = sshll.u32 %s839_s23, 4  ;;  %s1109_s25 = scalar_lea.hbm %s1469_s11, 64  ;;  %s843_s21 = int_to_ptr.hbm [resolvable:$true] %s842_s21 }
  0x2f   : > { %519 = vperm.xlu0 %1086, %v515_v5   ;;  %s1103_s15 = sshra.s32 %s843_s21, 4  ;;  %s1104_s15 = int_to_ptr.hbm [resolvable:$true] %s1103_s15 }
  0x30   : > { %s1105_s19 = scalar_lea.hbm %s1104_s15, 16  ;;  %p1110_p9 = scmp.lt.s32.totalorder %s1104_s15, %s1469_s11 }
  0x31   : > { %p1106_p5 = scmp.ne.s32.totalorder %s1104_s15, %s1105_s19  ;;  %p1111_p10 = scmp.lt.s32.totalorder %s1109_s25, %s1105_s19 }
  0x33   : > { %p1107_p6 = pnand %p1106_p5, %p1305_p3  ;;  %p1112_p11 = por %p1111_p10, %p1110_p9 }
  0x35   : > { %p1108_p7 = pneg %p1107_p6 }
  0x37   : > { %p1113_p12 = pnand %p1112_p11, %p1108_p7 }
  0x99   : > { %v554_v6 = vpop.permute.xlu0 %553 }
  0x9a   : > { %985 = vmatpush.msk.msra.mxu1 %vm526_vm0, %v554_v6  ;;  %v731_v6 = vld [vmem:[%s1465_s7] sm:$0xff] }
  0x9b   : > { %986 = vmatmul.msk.f32.vlgmr.msra.gmra.mxu1 %vm522_vm1, %v514_v1  ;;  %v734_v1 = vld [vmem:[%s1466_s8 + $0x8] sm:$0xff] }
  0x9c   : > { %996 = vmatpush.msk.msrb.mxu1 %vm526_vm0, %v516_v2 }
  0xa1   : > { %v520_v8 = vpop.permute.xlu0 %519 }
  0xa3   : > { %997 = vmatmul.msk.f32.vlgmr.msrb.gmra.mxu1 %vm522_vm1, %v777_v7  ;;  %v732_v7 = vld [vmem:[%s1465_s7 + $0x8] sm:$0xff] }
  0xa8   : > { %v547_v9 = vpop.f32.mrf.mxu2 }
  0xa9   : > { %v548_v10 = vadd.f32 %v547_v9, %v520_v8 }
  0xab   : > { %v1359_v11 = vmax.f32 %v548_v10, 0.0  ;;  %998 = vmatmul.msk.f32.gmra.mxu1 %vm522_vm1, %v778_v62 }
  0xad   : > { %661 = vrot.lane.b32.xlu0 %v1359_v11, %s1187_s29  ;;  %614 = vrot.lane.b32.xlu2 %v1359_v11, %s1186_s3  ;;  %s1189_s3 = smov 127  }
  0xae   : > { %619 = vrot.lane.b32.xlu1 %v1359_v11, %s1188_s14 }
  0xb0   : > { %v604_v13 = vpop.f32.mrf.mxu2 }
  0xb1   : > { %v605_v14 = vadd.f32 %v604_v13, %v520_v8 }
  0xb3   : > { %v607_v16 = vmax.f32 %v605_v14, 0.0 }
  0xb5   : > { %700 = vperm.xlu0 %1086, %v697_v15   ;;  %v612_v17 = vsel %vm611_vm2, %v607_v16, 0.0 }
  0xb6   : > { %623 = vrot.lane.b32.xlu1 %v612_v17, %s1188_s14 }
  0xbd   : > { %783 = vperm.xlu0 %1086, %v779_v18  }
  0xbe   : > { %666 = vrot.lane.b32.xlu1 %v1359_v11, %s1189_s3 }
 0x107   : > { %v615_v24 = vpop.permute.xlu2 %614 }
 0x118   : > { %v574_v20 = vpop.f32.mrf.mxu1 }
 0x119   : > { %v575_v21 = vadd.f32 %v574_v20, %v520_v8 }
 0x11b   : > { %v577_v22 = vmax.f32 %v575_v21, 0.0 }
 0x11d   : > { %v582_v25 = vsel %vm581_vm3, %v577_v22, 0.0 }
 0x11e   : > { %v618_v26 = vsel %vm617_vm4, %v582_v25, %v615_v24 }
 0x11f   : > { %655 = vrot.lane.b32.xlu1 %v618_v26, %s1189_s3  ;;  %v662_v42 = vpop.permute.xlu0 %661  ;;  %v682_v56 = vrot.slane %v618_v26, 4 }
 0x120   : > { %v620_v23 = vpop.permute.xlu1 %619  ;;  %v664_v47 = vsel %vm652_vm9, 0.0, %v662_v42  ;;  %v814_v9 = vpop.f32.mrf.mxu1 }
 0x121   : > { %v665_v50 = vmul.f32 %v989_v41, %v664_v47 }
 0x123   : > { %v685_v57 = vrot.slane %v665_v50, 4 }
 0x127   : > { %737 = vperm.xlu1 %1087, %v733_v63   ;;  %v701_v2 = vpop.permute.xlu0 %700 }
 0x128   : > { %v624_v27 = vpop.permute.xlu1 %623  ;;  %v817_v16 = vpop.f32.mrf.mxu1 }
 0x129   : > { %v627_v28 = vsel %vm626_vm5, %v620_v23, %v624_v27 }
 0x12a   : > { %677 = vrot.lane.b32.xlu2 %v627_v28, %s1189_s3  ;;  %v690_v44 = vrot.slane %v627_v28, 4 }
 0x12f   : > { %788 = vperm.xlu1 %1087, %v780_v0   ;;  %v784_v10 = vpop.permute.xlu0 %783 }
 0x130   : > { %v667_v32 = vpop.permute.xlu1 %666  ;;  %v815_v12 = vadd.f32 %v814_v9, %v784_v10 }
 0x131   : > { %v669_v38 = vsel %vm658_vm7, %v667_v32, 0.0 }
 0x132   : > { %672 = vrot.lane.b32.xlu2 %v627_v28, %s1187_s29  ;;  %v670_v39 = vmul.f32 %v990_v35, %v669_v38 }
 0x134   : > { %v688_v45 = vrot.slane %v670_v39, 4 }
 0x136   : > { %v694_v49 = vsel %vm526_vm0, %v1359_v11, %v688_v45 }
 0x13a   : > { %649 = vrot.lane.b32.xlu2 %v618_v26, %s1187_s29 }
 0x142   : > { %742 = vperm.xlu2 %1088, %v734_v1  }
 0x184   : > { %v678_v33 = vpop.permute.xlu2 %677 }
 0x185   : > { %v680_v36 = vsel %vm658_vm7, %v678_v33, 0.0 }
 0x186   : > { %v681_v37 = vmul.f32 %v990_v35, %v680_v36 }
 0x188   : > { %991 = vmatpush.msk.msra.mxu3 %vm526_vm0, %v681_v37 }
 0x18c   : > { %v673_v40 = vpop.permute.xlu2 %672 }
 0x18d   : > { %v675_v43 = vsel %vm652_vm9, 0.0, %v673_v40 }
 0x18e   : > { %v676_v46 = vmul.f32 %v989_v41, %v675_v43 }
 0x190   : > { %v695_v48 = vsel %vm526_vm0, %v676_v46, %v690_v44 }
 0x191   : > { %722 = vmatpush.msra.mxu3 %v695_v48  ;;  %v656_v52 = vpop.permute.xlu1 %655 }
 0x192   : > { %v659_v54 = vsel %vm658_vm7, %v656_v52, 0.0 }
 0x193   : > { %723 = vmatpush.msra.mxu3 %v694_v49  ;;  %v660_v58 = vmul.f32 %v990_v35, %v659_v54 }
 0x194   : > { %v650_v51 = vpop.permute.xlu2 %649 }
 0x195   : > { %v653_v53 = vsel %vm652_vm9, 0.0, %v650_v51  ;;  %v693_v59 = vsel %vm526_vm0, %v660_v58, %v685_v57 }
 0x196   : > { %v654_v55 = vmul.f32 %v989_v41, %v653_v53  ;;  %724 = vmatpush.msra.mxu3 %v693_v59 }
 0x198   : > { %v692_v60 = vsel %vm526_vm0, %v654_v55, %v682_v56 }
 0x199   : > { %725 = vmatpush.msra.mxu3 %v692_v60  ;;  %v738_v8 = vpop.permute.xlu1 %737 }
 0x19a   : > { %992 = vmatmul.msk.f32.vlgmr.msra.gmra.mxu3 %vm703_vm10, %v696_v61 }
 0x19c   : > { %v743_v18 = vpop.permute.xlu2 %742 }
 0x1a1   : > { %v789_v17 = vpop.permute.xlu1 %788 }
 0x1a2   : > { %v818_v20 = vadd.f32 %v817_v16, %v789_v17 }
 0x21d   : > { %v727_v3 = vpop.f32.mrf.mxu3 }
 0x21e   : > { %v728_v4 = vadd.f32 %v727_v3, %v701_v2 }
 0x220   : > { %v730_v5 = vmax.f32 %v728_v4, 0.0 }
 0x222   : > { %993 = vmatpush.msk.msra.mxu0 %vm526_vm0, %v730_v5 }
 0x223   : > { %994 = vmatmul.msk.f32.vlgmr.msra.gmra.mxu0 %vm522_vm1, %v731_v6 }
 0x22b   : > { %995 = vmatmul.msk.f32.gmra.mxu0 %vm522_vm1, %v732_v7 }
 0x2a0   : > { %v771_v11 = vpop.f32.mrf.mxu0 }
 0x2a1   : > { %v772_v13 = vadd.f32 %v771_v11, %v738_v8 }
 0x2a3   : > { %v820_v14 = vadd.f32 %v815_v12, %v772_v13 }
 0x2a5   : > { %v822_v15 = vmax.f32 %v820_v14, 0.0 }
 0x2a7   : > { %824 = vst [vmem:[%s477_s26] sm:$0xff] %v822_v15 }
 0x2a8   : > { %v774_v19 = vpop.f32.mrf.mxu0 }
 0x2a9   : > { %v775_v21 = vadd.f32 %v774_v19, %v743_v18 }
 0x2ab   : > { %v821_v22 = vadd.f32 %v818_v20, %v775_v21 }
 0x2ad   : > { %v823_v23 = vmax.f32 %v821_v22, 0.0 }
 0x2af   : > { %825 = vst [vmem:[%s477_s26 + $0x8] sm:$0xff] %v823_v23 }
 0x2b0   : > { %1116 = shalt.err (!%p1113_p12)
}
 0x2b1   : > { %s1191_s22 = smov 128   ;;  %s1192_s13 = smov 256  }
 0x2b2   : > { %s1193_s26 = smov 8  }
 0x2b3   : > { %1006 = dma.vmem_to_hbm [thread:$0]  (%p1305_p3), %s841_s27, 256, %s843_s21, %s827_s20, %s1191_s22, %s1192_s13, %s1193_s26  }
 0x2b4 PF: > { %p1012_p13 = scmp.ge.s32.totalorder %s1183_s24, 2  ;;  %s857_s29 = sand.u32 1, %s1155_s17  }
 0x2b5   : > { %s858_s14 = scalar_lea.sflag [#allocation3], %s857_s29 }
 0x2b6   : > { %p1009_p0 = pnand %p1012_p13, %p1314_p8 }
 0x2b8   : > { %p1010_p1 = pneg %p1009_p0 }
 0x2ba   : > { %1150 = dma.done.wait (%p1010_p1), %s858_s14, 256  }
 0x2bb   : > { %1152 = vsyncadd (%p1010_p1), %s858_s14, 4294967040  ;;  %s24_s24 = sadd.s32 1, %s1183_s24   ;;  %s1487_s23 = sld [smem:[#allocation5_spill]] }
 0x2bc   : > { %p21_p2 = scmp.ge.s32.totalorder %s24_s24, 6   ;;  %s1488_s19 = sld [smem:[#allocation10_spill]] }
 0x2bd   : > { %s1489_s20 = sld [smem:[#allocation6_spill]]  ;;  %s1493_s17 = smov %s1159_s18 }
 0x2be   : > { %s1490_s21 = sld [smem:[#allocation7_spill]] }
 0x2bf   : > { %s1491_s22 = sld [smem:[#allocation8_spill]] }
 0x2c0   : > { %s1492_s30 = sld [smem:[#allocation9_spill]] }
 0x2c1   : > { %s1494_s18 = smov %s1487_s23 }
 0x2c2   :  { %23 = sbr.rel (!%p21_p2) target bundleno = 8 (0x8), region = 105 }
 0x2c6   : > { %s1495_s23 = smov %s1492_s30 }
 0x2c7   :  { %864 = vsyncpa [#allocation3], 1 }
 0x2c8   :  { %866 = vsyncpa [#allocation3 + $0x1], 1 }

</bundles_post_ra>
